<compile_context>
chip_gen: v5e
topology: v5e:2x2
jax: 0.10.0
libtpu: 0.0.40
codegen_flags: <defaults>
</compile_context>

<pallas_src>
import functools

import jax
import jax.numpy as jnp
from jax import lax
from jax.experimental import pallas as pl
from jax.experimental.pallas import tpu as pltpu

EPS = 1e-07
LOG_CLAMP = -100.0


def _cdiv(a, b):
    return (a + b - 1) // b


def _bce_dice_kernel(o_ref, t_ref, out_ref, bce_acc_ref, dice_acc_ref, *,
                     block_n, tiles_per_core, n_rows, needs_row_mask,
                     beta, smooth, soft, binary_target):
    c = pl.program_id(0)           # "parallel" axis (TensorCore shard on v7x)
    j = pl.program_id(1)           # "arbitrary" reduction axis (row tiles)

    @pl.when(j == 0)
    def _():
        bce_acc_ref[...] = jnp.zeros_like(bce_acc_ref)
        dice_acc_ref[...] = jnp.zeros_like(dice_acc_ref)

    o = o_ref[...].astype(jnp.float32)   # cast in-kernel; HBM streams native dtype
    t = t_ref[...].astype(jnp.float32)

    # ---- BCE term (elementwise) ----
    oc = jnp.clip(o, EPS, 1.0 - EPS)
    if binary_target:
        # Single EUP log per element; exactly equal to the two-log path for t in {0,1}.
        p_sel = jnp.where(t > 0.5, oc, 1.0 - oc)
        logp = jnp.maximum(jnp.log(p_sel), LOG_CLAMP)
        if beta[0] == 1.0 and beta[1] == 1.0:
            bce = logp
        elif beta[0] == beta[1]:
            bce = jnp.float32(beta[0]) * logp
        else:
            bce = jnp.where(t > 0.5, jnp.float32(beta[0]), jnp.float32(beta[1])) * logp
    else:
        log0 = jnp.maximum(jnp.log(oc), LOG_CLAMP)
        log1 = jnp.maximum(jnp.log(1.0 - oc), LOG_CLAMP)
        term0 = t * log0
        term1 = (1.0 - t) * log1
        if beta[0] != 1.0:
            term0 = jnp.float32(beta[0]) * term0
        if beta[1] != 1.0:
            term1 = jnp.float32(beta[1]) * term1
        bce = term0 + term1

    bce_row = jnp.sum(bce, axis=1, keepdims=True)          # (block_n, 1)

    # ---- Dice term (per-(b,c) row reduction over H*W) ----
    od = o if soft else jnp.round(o)
    inter = jnp.sum(od * t, axis=1, keepdims=True)          # (block_n, 1)
    union = jnp.sum(od + t, axis=1, keepdims=True)          # (block_n, 1)
    dice_rows = 1.0 - (2.0 * inter + smooth) / (union + smooth)

    if needs_row_mask:
        # Only emitted when the grid over-covers the row axis (partial / clamped
        # duplicate tiles).  Mask the cheap per-row reductions, not the full tile.
        tile_idx = c * tiles_per_core + j
        row_ids = lax.broadcasted_iota(jnp.int32, (block_n, 1), 0) + tile_idx * block_n
        valid = row_ids < n_rows
        bce_row = jnp.where(valid, bce_row, 0.0)
        dice_rows = jnp.where(valid, dice_rows, 0.0)

    bce_acc_ref[...] += bce_row
    dice_acc_ref[...] += dice_rows

    @pl.when(j == pl.num_programs(1) - 1)
    def _():
        bce_sum = jnp.sum(bce_acc_ref[...])
        dice_sum = jnp.sum(dice_acc_ref[...])
        sub = lax.broadcasted_iota(jnp.int32, (1, 8, 128), 1)
        lane = lax.broadcasted_iota(jnp.int32, (1, 8, 128), 2)
        # Per-core partial sums: [0,0,0] = sum of (unnegated) BCE terms,
        #                        [0,0,1] = sum of per-row dice losses.
        out_ref[...] = jnp.where(
            (sub == 0) & (lane == 0), bce_sum,
            jnp.where((sub == 0) & (lane == 1), dice_sum, 0.0))


def bce_dice_loss(output, target, *, alpha=0.5, beta=(1.0, 1.0), soft=False,
                  smooth=1e-07, binary_target=False,
                  target_tile_bytes=4 * 1024 * 1024,     # raise to 8-16 MiB on v5e/v6e
                  num_cores=2,                            # TensorCore split (v7x); clamped
                  vmem_limit_bytes=48 * 1024 * 1024):
    assert output.shape == target.shape and output.ndim == 4
    B, C, H, W = output.shape
    n_rows = B * C
    n_cols = H * W
    n_total = n_rows * n_cols

    # No pad, no dtype cast: reshape is a free metadata op; dtype cast happens in VMEM.
    o2 = output.reshape(n_rows, n_cols)
    t2 = target.reshape(n_rows, n_cols)

    # Row-block size so the f32 working tile is ~target_tile_bytes; rounded to the
    # sublane tiling of the narrowest input dtype (8 for f32, 16 for bf16, 32 for int8).
    min_item = min(jnp.dtype(output.dtype).itemsize, jnp.dtype(target.dtype).itemsize)
    row_align = max(8, 32 // max(min_item, 1))
    block_n = max(row_align,
                  (target_tile_bytes // (n_cols * 4)) // row_align * row_align)
    block_n = min(block_n, _cdiv(n_rows, row_align) * row_align)

    num_tiles = _cdiv(n_rows, block_n)
    num_cores = max(1, min(int(num_cores), num_tiles))
    tiles_per_core = _cdiv(num_tiles, num_cores)
    needs_row_mask = (num_cores * tiles_per_core * block_n) != n_rows

    def in_map(c, j):
        tile = c * tiles_per_core + j
        # Clamp padded/duplicate tiles to the last real tile; their rows are masked.
        return (jnp.minimum(tile, num_tiles - 1), 0)

    kernel = functools.partial(
        _bce_dice_kernel,
        block_n=block_n, tiles_per_core=tiles_per_core, n_rows=n_rows,
        needs_row_mask=needs_row_mask,
        beta=tuple(float(b) for b in beta), smooth=float(smooth),
        soft=bool(soft), binary_target=bool(binary_target))

    partials = pl.pallas_call(
        kernel,
        out_shape=jax.ShapeDtypeStruct((num_cores, 8, 128), jnp.float32),
        grid_spec=pltpu.PrefetchScalarGridSpec(
            num_scalar_prefetch=0,
            grid=(num_cores, tiles_per_core),
            in_specs=[
                pl.BlockSpec((block_n, n_cols), in_map),
                pl.BlockSpec((block_n, n_cols), in_map),
            ],
            out_specs=pl.BlockSpec((1, 8, 128), lambda c, j: (c, 0, 0)),
            scratch_shapes=[
                pltpu.VMEM((block_n, 1), jnp.float32),   # per-row BCE partial sums
                pltpu.VMEM((block_n, 1), jnp.float32),   # per-row dice losses
            ],
        ),
        compiler_params=pltpu.CompilerParams(
            dimension_semantics=("parallel", "arbitrary"),
            vmem_limit_bytes=vmem_limit_bytes,
        ),
    )(o2, t2)

    # Tiny final combine across TensorCore partials (done in XLA).
    bce_sum = jnp.sum(partials[:, 0, 0])
    dice_sum = jnp.sum(partials[:, 0, 1])
    bce = -bce_sum / jnp.float32(n_total)
    dice = dice_sum / jnp.float32(n_rows)
    return alpha * bce + (1.0 - alpha) * dice


def bce_dice_loss_ref(output, target, alpha=0.5, beta=(1.0, 1.0), soft=False,
                      smooth=1e-07):
    o = output.astype(jnp.float32)
    t = target.astype(jnp.float32)

    oc = jnp.clip(o, EPS, 1.0 - EPS)
    log0 = jnp.maximum(jnp.log(oc), LOG_CLAMP)
    log1 = jnp.maximum(jnp.log(1.0 - oc), LOG_CLAMP)
    loss = beta[0] * t * log0 + beta[1] * (1.0 - t) * log1
    bce = jnp.mean(-loss)

    od = o if soft else jnp.round(o)
    inter = jnp.sum(od * t, axis=(2, 3))
    union = jnp.sum(od + t, axis=(2, 3))
    dice = jnp.mean(1.0 - (2.0 * inter + smooth) / (union + smooth))
    return alpha * bce + (1.0 - alpha) * dice


if __name__ == "__main__":
    key = jax.random.PRNGKey(0)
    k1, k2, k3, k4 = jax.random.split(key, 4)

    # Test 1: aligned shape, general (two-log) path.
    B, C, H, W = 2, 4, 16, 16
    output = jax.random.uniform(k1, (B, C, H, W), dtype=jnp.float32)
    target = (jax.random.uniform(k2, (B, C, H, W)) > 0.5).astype(jnp.float32)
    ref = bce_dice_loss_ref(output, target)

    res_general = bce_dice_loss(output, target)
    res_binary = bce_dice_loss(output, target, binary_target=True)

    # Test 2: unaligned shape (rows not a multiple of 8, cols not a multiple of 128)
    # exercising the partial-block row mask with no wrapper-side padding.
    output2 = jax.random.uniform(k3, (2, 3, 15, 15), dtype=jnp.float32)
    target2 = (jax.random.uniform(k4, (2, 3, 15, 15)) > 0.5).astype(jnp.float32)
    ref2 = bce_dice_loss_ref(output2, target2)
    res2 = bce_dice_loss(output2, target2)

    jax.block_until_ready((res_general, res_binary, res2))

    assert jnp.allclose(res_general, ref, rtol=1e-5, atol=1e-6), (res_general, ref)
    assert jnp.allclose(res_binary, ref, rtol=1e-5, atol=1e-6), (res_binary, ref)
    assert jnp.allclose(res2, ref2, rtol=1e-5, atol=1e-6), (res2, ref2)
    print("KERNEL_OK")
</pallas_src>

<mosaic_0001>
module attributes {stable_mosaic.version = 11 : i64} {
  func.func @_bce_dice_kernel(%arg0: i32, %arg1: i32, %arg2: memref<8x256xf32, #tpu.memory_space<vmem>>, %arg3: memref<8x256xf32, #tpu.memory_space<vmem>>, %arg4: memref<1x8x128xf32, #tpu.memory_space<vmem>>, %arg5: memref<8x1xf32, #tpu.memory_space<vmem>>, %arg6: memref<8x1xf32, #tpu.memory_space<vmem>>) attributes {dimension_semantics = [#tpu.dimension_semantics<parallel>, #tpu.dimension_semantics<arbitrary>], iteration_bounds = array<i64: 1, 1>, scalar_prefetch = 0 : i64, scratch_operands = 2 : i64, tpu.core_type = #tpu.core_type<tc>, window_params = [{transform_indices = @transform_0, window_bounds = array<i64: 8, 256>}, {transform_indices = @transform_1, window_bounds = array<i64: 8, 256>}, {transform_indices = @transform_2, window_bounds = array<i64: 1, 8, 128>}]} {
    %c0_i32 = arith.constant 0 : i32
    %0 = arith.cmpi eq, %arg1, %c0_i32 : i32
    %1 = arith.extui %0 : i1 to i32
    %c0_i32_0 = arith.constant 0 : i32
    %2 = arith.cmpi ne, %1, %c0_i32_0 : i32
    scf.if %2 {
      %cst_26 = arith.constant 0.000000e+00 : f32
      %49 = vector.broadcast %cst_26 : f32 to vector<8x1xf32>
      %c0_27 = arith.constant 0 : index
      %c0_28 = arith.constant 0 : index
      %50 = vector.load %arg5[%c0_27, %c0_28] : memref<8x1xf32, #tpu.memory_space<vmem>>, vector<8x1xf32>
      tpu.vector_store %arg5[%c0_27, %c0_28], %49 {strides = array<i32>} : memref<8x1xf32, #tpu.memory_space<vmem>>, vector<8x1xf32>,
      %cst_29 = arith.constant 0.000000e+00 : f32
      %51 = vector.broadcast %cst_29 : f32 to vector<8x1xf32>
      %c0_30 = arith.constant 0 : index
      %c0_31 = arith.constant 0 : index
      %52 = vector.load %arg6[%c0_30, %c0_31] : memref<8x1xf32, #tpu.memory_space<vmem>>, vector<8x1xf32>
      tpu.vector_store %arg6[%c0_30, %c0_31], %51 {strides = array<i32>} : memref<8x1xf32, #tpu.memory_space<vmem>>, vector<8x1xf32>,
    } else {
    }
    %c0 = arith.constant 0 : index
    %c0_1 = arith.constant 0 : index
    %3 = vector.load %arg2[%c0, %c0_1] : memref<8x256xf32, #tpu.memory_space<vmem>>, vector<8x256xf32>
    %c0_2 = arith.constant 0 : index
    %c0_3 = arith.constant 0 : index
    %4 = vector.load %arg3[%c0_2, %c0_3] : memref<8x256xf32, #tpu.memory_space<vmem>>, vector<8x256xf32>
    %cst = arith.constant 1.000000e-07 : f32
    %cst_4 = arith.constant 0.99999988 : f32
    %5 = vector.broadcast %cst : f32 to vector<8x256xf32>
    %6 = arith.maximumf %5, %3 : vector<8x256xf32>
    %7 = vector.broadcast %cst_4 : f32 to vector<8x256xf32>
    %8 = arith.minimumf %7, %6 : vector<8x256xf32>
    %9 = math.log %8 : vector<8x256xf32>
    %cst_5 = arith.constant -1.000000e+02 : f32
    %10 = vector.broadcast %cst_5 : f32 to vector<8x256xf32>
    %11 = arith.maximumf %9, %10 : vector<8x256xf32>
    %cst_6 = arith.constant 1.000000e+00 : f32
    %12 = vector.broadcast %cst_6 : f32 to vector<8x256xf32>
    %13 = arith.subf %12, %8 : vector<8x256xf32>
    %14 = math.log %13 : vector<8x256xf32>
    %cst_7 = arith.constant -1.000000e+02 : f32
    %15 = vector.broadcast %cst_7 : f32 to vector<8x256xf32>
    %16 = arith.maximumf %14, %15 : vector<8x256xf32>
    %17 = arith.mulf %4, %11 : vector<8x256xf32>
    %cst_8 = arith.constant 1.000000e+00 : f32
    %18 = vector.broadcast %cst_8 : f32 to vector<8x256xf32>
    %19 = arith.subf %18, %4 : vector<8x256xf32>
    %20 = arith.mulf %19, %16 : vector<8x256xf32>
    %21 = arith.addf %17, %20 : vector<8x256xf32>
    %cst_9 = arith.constant dense<0.000000e+00> : vector<8xf32>
    %22 = vector.multi_reduction <add>, %21, %cst_9 [1] : vector<8x256xf32> to vector<8xf32>
    %23 = vector.shape_cast %22 : vector<8xf32> to vector<8x1xf32>
    %24 = math.roundeven %3 : vector<8x256xf32>
    %25 = arith.mulf %24, %4 : vector<8x256xf32>
    %cst_10 = arith.constant dense<0.000000e+00> : vector<8xf32>
    %26 = vector.multi_reduction <add>, %25, %cst_10 [1] : vector<8x256xf32> to vector<8xf32>
    %27 = vector.shape_cast %26 : vector<8xf32> to vector<8x1xf32>
    %28 = arith.addf %24, %4 : vector<8x256xf32>
    %cst_11 = arith.constant dense<0.000000e+00> : vector<8xf32>
    %29 = vector.multi_reduction <add>, %28, %cst_11 [1] : vector<8x256xf32> to vector<8xf32>
    %30 = vector.shape_cast %29 : vector<8xf32> to vector<8x1xf32>
    %cst_12 = arith.constant 2.000000e+00 : f32
    %31 = vector.broadcast %cst_12 : f32 to vector<8x1xf32>
    %32 = arith.mulf %31, %27 : vector<8x1xf32>
    %cst_13 = arith.constant 1.000000e-07 : f32
    %33 = vector.broadcast %cst_13 : f32 to vector<8x1xf32>
    %34 = arith.addf %32, %33 : vector<8x1xf32>
    %cst_14 = arith.constant 1.000000e-07 : f32
    %35 = vector.broadcast %cst_14 : f32 to vector<8x1xf32>
    %36 = arith.addf %30, %35 : vector<8x1xf32>
    %37 = arith.divf %34, %36 : vector<8x1xf32>
    %cst_15 = arith.constant 1.000000e+00 : f32
    %38 = vector.broadcast %cst_15 : f32 to vector<8x1xf32>
    %39 = arith.subf %38, %37 : vector<8x1xf32>
    %c0_16 = arith.constant 0 : index
    %c0_17 = arith.constant 0 : index
    %40 = vector.load %arg5[%c0_16, %c0_17] : memref<8x1xf32, #tpu.memory_space<vmem>>, vector<8x1xf32>
    %41 = arith.addf %40, %23 : vector<8x1xf32>
    %c0_18 = arith.constant 0 : index
    %c0_19 = arith.constant 0 : index
    %42 = vector.load %arg5[%c0_18, %c0_19] : memref<8x1xf32, #tpu.memory_space<vmem>>, vector<8x1xf32>
    tpu.vector_store %arg5[%c0_18, %c0_19], %41 {strides = array<i32>} : memref<8x1xf32, #tpu.memory_space<vmem>>, vector<8x1xf32>,
    %c0_20 = arith.constant 0 : index
    %c0_21 = arith.constant 0 : index
    %43 = vector.load %arg6[%c0_20, %c0_21] : memref<8x1xf32, #tpu.memory_space<vmem>>, vector<8x1xf32>
    %44 = arith.addf %43, %39 : vector<8x1xf32>
    %c0_22 = arith.constant 0 : index
    %c0_23 = arith.constant 0 : index
    %45 = vector.load %arg6[%c0_22, %c0_23] : memref<8x1xf32, #tpu.memory_space<vmem>>, vector<8x1xf32>
    tpu.vector_store %arg6[%c0_22, %c0_23], %44 {strides = array<i32>} : memref<8x1xf32, #tpu.memory_space<vmem>>, vector<8x1xf32>,
    %c0_i32_24 = arith.constant 0 : i32
    %46 = arith.cmpi eq, %arg1, %c0_i32_24 : i32
    %47 = arith.extui %46 : i1 to i32
    %c0_i32_25 = arith.constant 0 : i32
    %48 = arith.cmpi ne, %47, %c0_i32_25 : i32
    scf.if %48 {
      %c0_26 = arith.constant 0 : index
      %c0_27 = arith.constant 0 : index
      %49 = vector.load %arg5[%c0_26, %c0_27] : memref<8x1xf32, #tpu.memory_space<vmem>>, vector<8x1xf32>
      %50 = vector.shape_cast %49 : vector<8x1xf32> to vector<1x8x1xf32>
      %cst_28 = arith.constant dense<0.000000e+00> : vector<1xf32>
      %51 = vector.multi_reduction <add>, %50, %cst_28 [1, 2] : vector<1x8x1xf32> to vector<1xf32>
      %52 = vector.shape_cast %51 : vector<1xf32> to vector<1x1x1xf32>
      %53 = vector.extract %52[0, 0, 0] : f32 from vector<1x1x1xf32>
      %c0_29 = arith.constant 0 : index
      %c0_30 = arith.constant 0 : index
      %54 = vector.load %arg6[%c0_29, %c0_30] : memref<8x1xf32, #tpu.memory_space<vmem>>, vector<8x1xf32>
      %55 = vector.shape_cast %54 : vector<8x1xf32> to vector<1x8x1xf32>
      %cst_31 = arith.constant dense<0.000000e+00> : vector<1xf32>
      %56 = vector.multi_reduction <add>, %55, %cst_31 [1, 2] : vector<1x8x1xf32> to vector<1xf32>
      %57 = vector.shape_cast %56 : vector<1xf32> to vector<1x1x1xf32>
      %58 = vector.extract %57[0, 0, 0] : f32 from vector<1x1x1xf32>
      %59 = tpu.iota {dimensions = array<i32: 1>} : vector<1x8x128xi32>
      %60 = tpu.iota {dimensions = array<i32: 2>} : vector<1x8x128xi32>
      %c0_i32_32 = arith.constant 0 : i32
      %61 = vector.broadcast %c0_i32_32 : i32 to vector<1x8x128xi32>
      %62 = arith.cmpi eq, %59, %61 : vector<1x8x128xi32>
      %c0_i32_33 = arith.constant 0 : i32
      %63 = vector.broadcast %c0_i32_33 : i32 to vector<1x8x128xi32>
      %64 = arith.cmpi eq, %60, %63 : vector<1x8x128xi32>
      %65 = arith.andi %62, %64 : vector<1x8x128xi1>
      %c0_i32_34 = arith.constant 0 : i32
      %66 = vector.broadcast %c0_i32_34 : i32 to vector<1x8x128xi32>
      %67 = arith.cmpi eq, %59, %66 : vector<1x8x128xi32>
      %c1_i32 = arith.constant 1 : i32
      %68 = vector.broadcast %c1_i32 : i32 to vector<1x8x128xi32>
      %69 = arith.cmpi eq, %60, %68 : vector<1x8x128xi32>
      %70 = arith.andi %67, %69 : vector<1x8x128xi1>
      %cst_35 = arith.constant 0.000000e+00 : f32
      %71 = vector.broadcast %58 : f32 to vector<1x8x128xf32>
      %72 = vector.broadcast %cst_35 : f32 to vector<1x8x128xf32>
      %73 = arith.select %70, %71, %72 : vector<1x8x128xi1>, vector<1x8x128xf32>
      %74 = vector.broadcast %53 : f32 to vector<1x8x128xf32>
      %75 = arith.select %65, %74, %73 : vector<1x8x128xi1>, vector<1x8x128xf32>
      %c0_36 = arith.constant 0 : index
      %c0_37 = arith.constant 0 : index
      %c0_38 = arith.constant 0 : index
      %76 = vector.load %arg4[%c0_36, %c0_37, %c0_38] : memref<1x8x128xf32, #tpu.memory_space<vmem>>, vector<1x8x128xf32>
      tpu.vector_store %arg4[%c0_36, %c0_37, %c0_38], %75 {strides = array<i32>} : memref<1x8x128xf32, #tpu.memory_space<vmem>>, vector<1x8x128xf32>,
    } else {
    }
    return
  }
  func.func @transform_0(%arg0: i32, %arg1: i32) -> (i32, i32) {
    %c1_i32 = arith.constant 1 : i32
    %0 = arith.muli %arg0, %c1_i32 : i32
    %1 = arith.addi %0, %arg1 : i32
    %c0_i32 = arith.constant 0 : i32
    %2 = arith.minsi %1, %c0_i32 : i32
    %c0_i32_0 = arith.constant 0 : i32
    %c0_i32_1 = arith.constant 0 : i32
    return %2, %c0_i32_0 : i32, i32
  }
  func.func @transform_1(%arg0: i32, %arg1: i32) -> (i32, i32) {
    %c1_i32 = arith.constant 1 : i32
    %0 = arith.muli %arg0, %c1_i32 : i32
    %1 = arith.addi %0, %arg1 : i32
    %c0_i32 = arith.constant 0 : i32
    %2 = arith.minsi %1, %c0_i32 : i32
    %c0_i32_0 = arith.constant 0 : i32
    %c0_i32_1 = arith.constant 0 : i32
    return %2, %c0_i32_0 : i32, i32
  }
  func.func @transform_2(%arg0: i32, %arg1: i32) -> (i32, i32, i32) {
    %c0_i32 = arith.constant 0 : i32
    %c0_i32_0 = arith.constant 0 : i32
    %c0_i32_1 = arith.constant 0 : i32
    return %arg0, %c0_i32, %c0_i32_0 : i32, i32, i32
  }
}

</mosaic_0001>

<bundles_post_ra>
// kernel: tpu_custom_call.1
= control target key start
LH: loop header
LB: loop body
LE: loop exit
PB: predicated region body
PF: predicated region fallthrough
CT: control target
= control target key end

     0   :  { %7 = vsyncpa [#allocation5], 0  ;;  %s343_s0 = inlined_call_operand.hbm [shape: f32[8,256], index: 0, kind: input, shape index: {}]   ;;  %s344_s1 = inlined_call_operand.hbm [shape: f32[8,256], index: 1, kind: input, shape index: {}]   ;;  %s345_s2 = inlined_call_operand.hbm [shape: f32[1,8,128], index: 2, kind: output, shape index: {}]  }
   0x1   :  { %8 = vsyncpa [#allocation8], 0 }
   0x2   :  { %9 = vsyncpa [#allocation6], 0  ;;  %s21_s11 = sshll.u32 %s343_s0, 4  ;;  %s309_s12 = smov [#allocation4]   ;;  %s22_s11 = int_to_ptr.hbm [resolvable:$true] %s21_s11 }
   0x3   :  { %s23_s13 = sshll.u32 %s309_s12, 4  ;;  %s38_s16 = sshll.u32 %s344_s1, 4  ;;  %s24_s13 = int_to_ptr.vmem [resolvable:$true] %s23_s13  ;;  %s39_s16 = int_to_ptr.hbm [resolvable:$true] %s38_s16 }
   0x4   :  { %26 = dma.hbm_to_vmem [thread:$0]  %s22_s11, 256, %s24_s13, [#allocation5]  }
   0x5   :  { %s310_s17 = smov [#allocation7]  }
   0x6   :  { %s40_s18 = sshll.u32 %s310_s17, 4  ;;  %s41_s18 = int_to_ptr.vmem [resolvable:$true] %s40_s18 }
   0x7   :  { %43 = dma.hbm_to_vmem [thread:$0]  %s39_s16, 256, %s41_s18, [#allocation8]  }
   0x8   :  { %303 = dma.done.wait [#allocation5], 256  }
   0x9   :  { %304 = vsyncadd [#allocation5], 4294967040 }
   0xa   :  { %305 = dma.done.wait [#allocation8], 256  }
   0xb   :  { %306 = vsyncadd [#allocation8], 4294967040  ;;  %v65_v0 = vld [vmem:[#allocation4] sm:$0xff]  ;;  %v66_v1 = vld [vmem:[#allocation4 + $0x8] sm:$0xff]  ;;  %vm62_vm2 = vcmask 7168   ;;  %v311_v51 = vmov 0.0  }
   0xc   :  { %v197_v2 = vand.u32 2147483647, %v65_v0  ;;  %v199_v3 = vcvt.f32.s32 %v65_v0  ;;  %v207_v4 = vcvt.f32.s32 %v66_v1  ;;  %v69_v5 = vmax.f32 %v65_v0, 1e-07  ;;  %v67_v18 = vld [vmem:[#allocation7] sm:$0xff]  ;;  %v68_v20 = vld [vmem:[#allocation7 + $0x8] sm:$0xff] }
   0xd   :  { %v70_v6 = vmax.f32 %v66_v1, 1e-07  ;;  %v202_v8 = vand.u32 2147483648, %v65_v0  ;;  %v205_v9 = vand.u32 2147483647, %v66_v1  ;;  %v210_v11 = vand.u32 2147483648, %v66_v1 }
   0xe   :  { %v200_v7 = vcvt.s32.f32 %v199_v3  ;;  %v208_v10 = vcvt.s32.f32 %v207_v4  ;;  %v71_v12 = vmin.f32 %v69_v5, 0.9999999  ;;  %vm198_vm0 = vcmp.lt.f32.partialorder %v197_v2, 8388608.0  ;;  %64 = vst.msk [vmem:[#allocation3] sm:$0xff] %vm62_vm2, %v311_v51  ;;  %s312_s0 = smov [#allocation9]   ;;  %s182_s22 = sshll.u32 %s345_s2, 4  ;;  %s183_s22 = int_to_ptr.hbm [resolvable:$true] %s182_s22 }
   0xf   :  { %v72_v13 = vmin.f32 %v70_v6, 0.9999999  ;;  %vm206_vm1 = vcmp.lt.f32.partialorder %v205_v9, 8388608.0  ;;  %v89_v32 = vsub.f32 1.0, %v67_v18  ;;  %v90_v40 = vsub.f32 1.0, %v68_v20  ;;  %63 = vst.msk [vmem:[#allocation2] sm:$0xff] %vm62_vm2, %v311_v51 }
  0x10   :  { %v201_v14 = vand.u32 2147483647, %v200_v7  ;;  %v209_v15 = vand.u32 2147483647, %v208_v10  ;;  %221 = vlog2.f32 %v71_v12  ;;  %v79_v16 = vsub.f32 1.0, %v71_v12  ;;  %s180_s1 = sshll.u32 %s312_s0, 4  ;;  %s181_s1 = int_to_ptr.vmem [resolvable:$true] %s180_s1 }
  0x11   :  { %v80_v17 = vsub.f32 1.0, %v72_v13  ;;  %223 = vlog2.f32 %v72_v13 }
  0x12   :  { %v203_v19 = vor.u32 %v202_v8, %v201_v14  ;;  %v211_v21 = vor.u32 %v210_v11, %v209_v15  ;;  %225 = vlog2.f32 %v79_v16 }
  0x13   :  { %227 = vlog2.f32 %v80_v17 }
  0x14   :  { %v204_v22 = vsel %vm198_vm0, %v203_v19, %v65_v0  ;;  %v212_v23 = vsel %vm206_vm1, %v211_v21, %v66_v1 }
  0x15   :  { %v105_v24 = vadd.f32 %v204_v22, %v67_v18  ;;  %v106_v25 = vadd.f32 %v212_v23, %v68_v20  ;;  %v100_v34 = vmul.f32 %v204_v22, %v67_v18  ;;  %v101_v35 = vmul.f32 %v212_v23, %v68_v20  ;;  %v133_v7 = vld [vmem:[#allocation3] sm:$0xff] }
  0x16   :  { %v222_v26 = vpop.eup %221  ;;  %v129_v56 = vld [vmem:[#allocation2] sm:$0xff] }
  0x17   :  { %v224_v27 = vpop.eup %223  ;;  %v107_v28 = vadd.f32 %v106_v25, %v105_v24  ;;  %v74_v29 = vmul.f32 0.6931472, %v222_v26  ;;  %v102_v45 = vadd.f32 %v101_v35, %v100_v34 }
  0x18   :  { %v226_v30 = vpop.eup %225  ;;  %v76_v31 = vmul.f32 0.6931472, %v224_v27 }
  0x19   :  { %v228_v33 = vpop.eup %227  ;;  %108 = vadd.xlane.f32.xlu0 %v107_v28  ;;  %v77_v36 = vmax.f32 %v74_v29, -100.0  ;;  %v82_v37 = vmul.f32 0.6931472, %v226_v30  ;;  %v161_v28 = vlaneseq }
  0x1a   :  { %v78_v38 = vmax.f32 %v76_v31, -100.0  ;;  %v84_v39 = vmul.f32 0.6931472, %v228_v33 }
  0x1b   :  { %v85_v41 = vmax.f32 %v82_v37, -100.0  ;;  %v87_v42 = vmul.f32 %v77_v36, %v67_v18  ;;  %v162_v29 = vshrl.u32 %v161_v28, 7  ;;  %v164_v30 = vand.u32 127, %v161_v28 }
  0x1c   :  { %v86_v43 = vmax.f32 %v84_v39, -100.0  ;;  %v88_v44 = vmul.f32 %v78_v38, %v68_v20 }
  0x1d   :  { %v91_v46 = vmul.f32 %v89_v32, %v85_v41  ;;  %vm165_vm7 = vcmp.eq.s32.totalorder %v162_v29, 0  ;;  %vm168_vm8 = vcmp.eq.s32.totalorder %v164_v30, 1  ;;  %vm166_vm9 = vcmp.eq.s32.totalorder %v164_v30, 0 }
  0x1e   :  { %v92_v47 = vmul.f32 %v90_v40, %v86_v43  ;;  %vm169_vm10 = vmand %vm165_vm7, %vm168_vm8 }
  0x1f   :  { %v93_v48 = vadd.f32 %v91_v46, %v87_v42  ;;  %vm167_vm11 = vmand %vm165_vm7, %vm166_vm9 }
  0x20   :  { %v94_v49 = vadd.f32 %v92_v47, %v88_v44 }
  0x21   :  { %103 = vadd.xlane.f32.xlu0 %v102_v45 }
  0x22   :  { %v95_v50 = vadd.f32 %v94_v49, %v93_v48 }
  0x24   :  { %96 = vadd.xlane.f32.xlu1 %v95_v50 }
  0x8c   :  { %v109_v52 = vpop.xlane.xlu0 %108 }
  0x8d   :  { %v112_v53 = vadd.f32 1e-07, %v109_v52 }
  0x8f   :  { %229 = vrcp.f32 %v112_v53  ;;  %v124_v62 = vand.u32 2147483648, %v112_v53  ;;  %v122_v0 = vand.u32 2147483647, %v112_v53  ;;  %vm118_vm4 = vweird.f32 %v112_v53 }
  0x91   :  { %v125_v3 = vor.u32 1.1754944e-38, %v124_v62  ;;  %vm123_vm6 = vcmp.eq.f32.partialorder %v122_v0, 8.507059e+37 }
  0x94   :  { %v104_v55 = vpop.xlane.xlu0 %103 }
  0x95   :  { %v230_v54 = vpop.eup %229  ;;  %v110_v60 = vmul.f32 2.0, %v104_v55 }
  0x96   :  { %v114_v57 = vmul.f32 %v230_v54, %v112_v53  ;;  %vm119_vm3 = vweird.f32 %v230_v54 }
  0x97   :  { %v97_v58 = vpop.xlane.xlu1 %96  ;;  %v111_v2 = vadd.f32 1e-07, %v110_v60  ;;  %vm120_vm5 = vmor %vm118_vm4, %vm119_vm3 }
  0x98   :  { %v115_v59 = vsub.f32 1.0, %v114_v57  ;;  %v130_v61 = vadd.f32 %v129_v56, %v97_v58 }
  0x9a   :  { %v116_v63 = vmul.f32 %v230_v54, %v115_v59  ;;  %132 = vst.msk [vmem:[#allocation2] sm:$0xff] %vm62_vm2, %v130_v61 }
  0x9c   :  { %v117_v1 = vadd.f32 %v230_v54, %v116_v63 }
  0x9e   :  { %v121_v4 = vsel %vm120_vm5, %v230_v54, %v117_v1 }
  0x9f   :  { %v126_v5 = vsel %vm123_vm6, %v125_v3, %v121_v4 }
  0xa0   :  { %v127_v6 = vmul.f32 %v126_v5, %v111_v2 }
  0xa1   :  { %v139_v8 = vld [vmem:[#allocation2] sm:$0xff] }
  0xa2   :  { %v128_v9 = vsub.f32 1.0, %v127_v6  ;;  %v140_v10 = vsel %vm62_vm2, %v139_v8, 0.0 }
  0xa3   :  { %141 = vadd.xlane.f32.xlu1 %v140_v10 }
  0xa4   :  { %v134_v11 = vadd.f32 %v133_v7, %v128_v9 }
  0xa6   :  { %135 = vst.msk [vmem:[#allocation3] sm:$0xff] %vm62_vm2, %v134_v11 }
  0xad   :  { %v150_v12 = vld [vmem:[#allocation3] sm:$0xff] }
  0xae   :  { %v151_v13 = vsel %vm62_vm2, %v150_v12, 0.0 }
  0xaf   :  { %152 = vadd.xlane.f32.xlu2 %v151_v13 }
 0x116   :  { %v142_v14 = vpop.xlane.xlu1 %141 }
 0x117   :  { %v143_v15 = vrot.slane %v142_v14, 4 }
 0x119   :  { %v144_v16 = vadd.f32 %v143_v15, %v142_v14 }
 0x11b   :  { %v145_v17 = vrot.slane %v144_v16, 2 }
 0x11d   :  { %v146_v18 = vadd.f32 %v145_v17, %v144_v16 }
 0x11f   :  { %v147_v19 = vrot.slane %v146_v18, 1 }
 0x121   :  { %v148_v20 = vadd.f32 %v147_v19, %v146_v18 }
 0x122   :  { %v153_v21 = vpop.xlane.xlu2 %152 }
 0x123   :  { %v154_v22 = vrot.slane %v153_v21, 4  ;;  %213 = vpush %v148_v20 }
 0x125   :  { %v155_v23 = vadd.f32 %v154_v22, %v153_v21 }
 0x127   :  { %v156_v24 = vrot.slane %v155_v23, 2 }
 0x129   :  { %v157_v25 = vadd.f32 %v156_v24, %v155_v23 }
 0x12b   :  { %v158_v26 = vrot.slane %v157_v25, 1 }
 0x12d   :  { %v159_v27 = vadd.f32 %v158_v26, %v157_v25 }
 0x12f   :  { %215 = vpush %v159_v27 }
 0x154   :  { %s214_s19 = spop %213 }
 0x155   :  { %v172_v32 = vstv %s214_s19 }
 0x160   :  { %s216_s23 = spop %215 }
 0x161   :  { %v170_v31 = vstv %s216_s23 }
 0x162   :  { %v171_v33 = vsel %vm169_vm10, %v170_v31, 0.0 }
 0x163   :  { %v173_v34 = vsel %vm167_vm11, %v172_v32, %v171_v33 }
 0x164   :  { %174 = vst [vmem:[#allocation9] sm:$0xff] %v173_v34 }
 0x165   :  { %185 = dma.vmem_to_hbm [thread:$0]  %s181_s1, 128, %s183_s22, [#allocation6]  }
 0x166   :  { %307 = dma.done.wait [#allocation6], 128  }
 0x167   :  { %308 = vsyncadd [#allocation6], 4294967168 }
 0x168   :  { %190 = vsyncpa [#allocation5], 1 }
 0x169   :  { %191 = vsyncpa [#allocation8], 1 }
 0x16a   :  { %192 = vsyncpa [#allocation6], 1 }

</bundles_post_ra>
